<compile_context>
chip_gen: v7x
topology: tpu7x:2x2x1
jax: 0.10.0
libtpu: 0.0.40
codegen_flags: <defaults>
</compile_context>

<pallas_src>
import functools

import jax
import jax.numpy as jnp
from jax.experimental import pallas as pl
from jax.experimental.pallas import tpu as pltpu


def _nonlocal_kernel(x_ref, wpk_ref, out_ref, *, C, K, block_t, mm_dtype):
    """One grid step: a (block_b, C, L) slab, L = block_t * K lanes.

    wpk_ref packs every parameter into one (C+2, C+2) array:
      [:, :C]    fused projection  [ (wg@ww/K)^T ; (wt@wa^T)^T ; (wp@wb^T)^T ]
      [:, C]     fused projection bias (g/W-folded bias ; theta+phi biases ; 0)
      [:C, C+1]  W-conv bias
    """
    L = block_t * K
    w = wpk_ref[:, :C].astype(mm_dtype)          # (C+2, C)
    b_proj = wpk_ref[:, C:C + 1]                 # (C+2, 1) f32
    b_w = wpk_ref[:C, C + 1:C + 2]               # (C, 1)   f32

    # Same-time (block-diagonal) mask, built in-kernel (no HBM DMA).
    # tid = iota // K, written division-free as a sum of boundary indicators.
    if block_t > 1:
        ri = jax.lax.broadcasted_iota(jnp.int32, (L, L), 0)
        ci = jax.lax.broadcasted_iota(jnp.int32, (L, L), 1)
        rt = jnp.zeros((L, L), jnp.int32)
        ct = jnp.zeros((L, L), jnp.int32)
        for m in range(1, block_t):
            rt = rt + (ri >= m * K).astype(jnp.int32)
            ct = ct + (ci >= m * K).astype(jnp.int32)
        same_t = rt == ct
    else:
        same_t = None                            # single time step: no masking needed

    for b in range(x_ref.shape[0]):              # static unroll over the batch sub-block
        xc = x_ref[b]                            # (C, L) f32

        # Single fused projection matmul: g/theta/phi 1x1 convs + W conv + 1/N.
        p = jnp.dot(w, xc.astype(mm_dtype),
                    preferred_element_type=jnp.float32) + b_proj      # (C+2, L) f32
        g_t = p[:C, :]                           # (C, L): ((x@Wg+bg)@Ww / K)^T
        s_t = p[C:C + 1, :]                      # (1, L): theta scalar + both biases
        s_p = jnp.transpose(p[C + 1:C + 2, :])   # (L, 1): phi scalar (single 1xL flip)

        pair = jnp.maximum(s_p + s_t, 0.0)       # (L, L): relu(s_theta[i] + s_phi[j])
        ft = pair if same_t is None else jnp.where(same_t, pair, 0.0)

        # z^T = g_proj^T @ f^T + b_W + x   (y = (f/N)@g and the W conv folded in g_t)
        out_ref[b] = (jnp.dot(g_t.astype(mm_dtype), ft.astype(mm_dtype),
                              preferred_element_type=jnp.float32)
                      + b_w + xc)


def tem_non_local_block(x_nchw, params, *, block_b=None, block_t=None,
                        mm_dtype=jnp.float32):
    """x_nchw: (B, C, T, K) float32.  Returns (B, C, T, K).

    block_b / block_t control the grid:
      * default (block_b=B, block_t=T) collapses everything into one grid step —
        best for single-TC v5e/v6e at small sizes (per-step overhead dominates).
      * on v7x (2 TCs) pass block_b=1 and/or a block_t with block_t*K == 128 to
        expose >=2 "parallel" steps; measure both forms.
      * at production T choose block_t*K == 128 so the (L,L) attention slab stays
        64 KiB regardless of T (a full (T*K)^2 map would exhaust v7x's 64 MiB VMEM).
    mm_dtype: MXU-operand dtype (bf16 recommended at production sizes; f32 here
      for exact small-shape checks).  The relu/mask/residual epilogue stays f32.
    """
    B, C, T, K = x_nchw.shape
    TK = T * K
    f32 = jnp.float32
    if block_b is None:
        block_b = B
    if block_t is None:
        block_t = T
    assert B % block_b == 0 and T % block_t == 0
    L = block_t * K
    assert (block_t == T) or (L % 128 == 0), "block_t*K must be 128-lane aligned"
    # TODO(synk): for T*K not a multiple of 128, pad the joint axis and extend the
    # same-time mask to the padded joints before the lane-dense claims hold.

    wg, bg = params["wg"], params["bg"]
    wt, bt = params["wt"], params["bt"]
    wp, bp = params["wp"], params["bp"]
    wa, wb = params["wa"], params["wb"]
    ww, bw = params["ww"], params["bw"]

    # ---- host-side algebraic folding (done once, outside the kernel) ----
    inv_n = 1.0 / K                                   # true K (the f/N normalisation)
    wgw_t = (wg @ ww).T * inv_n                       # (C, C): g -> W conv -> /N, transposed
    bgw_t = (bg @ ww).T * inv_n                       # (C, 1)
    w_ta_t = (wt @ wa.T).T                            # (1, C): theta-side vector
    w_pb_t = (wp @ wb.T).T                            # (1, C): phi-side vector
    c_tp = bt @ wa.T + bp @ wb.T                      # (1, 1): both scalar biases -> theta row

    w_fused = jnp.concatenate([wgw_t, w_ta_t, w_pb_t], axis=0)            # (C+2, C)
    b_fused = jnp.concatenate([bgw_t, c_tp, jnp.zeros((1, 1), f32)], axis=0)   # (C+2, 1)
    bw_pad = jnp.concatenate([bw.T, jnp.zeros((2, 1), f32)], axis=0)      # (C+2, 1)
    # Single packed parameter array -> one tiny weight DMA for the whole kernel.
    wpk = jnp.concatenate([w_fused, b_fused, bw_pad], axis=1).astype(f32)  # (C+2, C+2)

    # Free reshape (trailing contiguous dims) -- no NCHW<->NHWC transpose round-trip.
    x_flat = x_nchw.reshape(B, C, TK).astype(f32)                          # (B, C, TK)

    kernel = functools.partial(_nonlocal_kernel, C=C, K=K, block_t=block_t,
                               mm_dtype=mm_dtype)
    flops = 2 * B * (C + 2) * C * TK + 2 * B * C * TK * L
    bytes_accessed = 2 * B * C * TK * 4 + (C + 2) * (C + 2) * 4

    out = pl.pallas_call(
        kernel,
        out_shape=jax.ShapeDtypeStruct((B, C, TK), f32),
        grid_spec=pltpu.PrefetchScalarGridSpec(
            num_scalar_prefetch=0,
            grid=(B // block_b, T // block_t),
            in_specs=[
                pl.BlockSpec((block_b, C, L), lambda bi, ti: (bi, 0, ti)),  # x slab
                pl.BlockSpec((C + 2, C + 2), lambda bi, ti: (0, 0)),        # packed params
            ],
            out_specs=pl.BlockSpec((block_b, C, L), lambda bi, ti: (bi, 0, ti)),
        ),
        compiler_params=pltpu.CompilerParams(
            dimension_semantics=("parallel", "parallel")),
        input_output_aliases={0: 0},      # donate x_flat -> z (residual written in place)
        cost_estimate=pl.CostEstimate(flops=flops, transcendentals=0,
                                      bytes_accessed=bytes_accessed),
    )(x_flat, wpk)

    return out.reshape(B, C, T, K)


def ref_forward(x_nchw, params):
    """Pure-JAX reference matching the PyTorch forward pass (no folding)."""
    x = jnp.transpose(x_nchw, (0, 2, 3, 1))                      # (B, T, K, C)
    K = x.shape[2]
    g     = jnp.einsum("btkc,ci->btki", x, params["wg"]) + params["bg"][0]
    theta = jnp.einsum("btkc,ci->btki", x, params["wt"]) + params["bt"][0]
    phi   = jnp.einsum("btkc,ci->btki", x, params["wp"]) + params["bp"][0]
    s_t = jnp.einsum("btki,i->btk", theta, params["wa"][0])
    s_p = jnp.einsum("btki,i->btk", phi, params["wb"][0])
    f = jax.nn.relu(s_t[..., :, None] + s_p[..., None, :]) / K   # (B, T, K, K)
    y = jnp.einsum("btij,btjc->btic", f, g)                      # (B, T, K, IC)
    z = jnp.einsum("btki,ic->btkc", y, params["ww"]) + params["bw"][0] + x
    return jnp.transpose(z, (0, 3, 1, 2))


def make_params(key, in_channels, inter_channels):
    """Deterministic synthetic parameters (shapes follow the module __init__).
    NOTE: PyTorch zero-inits the final W conv (bn_layer=False); small random
    values are used instead so the whole compute path is exercised."""
    C, IC = in_channels, inter_channels
    ks = jax.random.split(key, 11)
    scale = lambda fan_in: jnp.sqrt(2.0 / fan_in)  # kaiming-normal-ish
    return {
        "wg": jax.random.normal(ks[0], (C, IC), jnp.float32) * scale(C),
        "bg": jax.random.normal(ks[1], (1, IC), jnp.float32) * 0.01,
        "wt": jax.random.normal(ks[2], (C, IC), jnp.float32) * scale(C),
        "bt": jax.random.normal(ks[3], (1, IC), jnp.float32) * 0.01,
        "wp": jax.random.normal(ks[4], (C, IC), jnp.float32) * scale(C),
        "bp": jax.random.normal(ks[5], (1, IC), jnp.float32) * 0.01,
        "wa": jax.random.normal(ks[6], (1, IC), jnp.float32) * scale(2 * IC),
        "wb": jax.random.normal(ks[7], (1, IC), jnp.float32) * scale(2 * IC),
        "ww": jax.random.normal(ks[8], (IC, C), jnp.float32) * scale(IC),
        "bw": jax.random.normal(ks[9], (1, C), jnp.float32) * 0.01,
    }


if __name__ == "__main__":
    B, C, T, K = 2, 16, 8, 16          # batch, in_channels, time, joints (T*K = 128 lanes)
    IC = C // 2                        # inter_channels = in_channels // 2

    key = jax.random.PRNGKey(0)
    kx, kp = jax.random.split(key)
    x = jax.random.normal(kx, (B, C, T, K), jnp.float32)   # NCHW input
    params = make_params(kp, C, IC)

    z = tem_non_local_block(x, params)
    z = jax.block_until_ready(z)

    z_ref = ref_forward(x, params)
    assert z.shape == x.shape
    assert jnp.allclose(z, z_ref, atol=1e-4, rtol=1e-4)
    print("KERNEL_OK")
</pallas_src>

<mosaic_0001>
module attributes {stable_mosaic.version = 11 : i64} {
  func.func @_nonlocal_kernel(%arg0: i32, %arg1: i32, %arg2: memref<2x16x128xf32, #tpu.memory_space<vmem>>, %arg3: memref<18x18xf32, #tpu.memory_space<vmem>>, %arg4: memref<2x16x128xf32, #tpu.memory_space<vmem>>) attributes {dimension_semantics = [#tpu.dimension_semantics<parallel>, #tpu.dimension_semantics<parallel>], iteration_bounds = array<i64: 1, 1>, scalar_prefetch = 0 : i64, scratch_operands = 0 : i64, tpu.core_type = #tpu.core_type<tc>, window_params = [{transform_indices = @transform_0, window_bounds = array<i64: 2, 16, 128>}, {pipeline_mode = #tpu.pipeline_mode<synchronous>, transform_indices = @transform_1, window_bounds = array<i64: 18, 18>}, {transform_indices = @transform_2, window_bounds = array<i64: 2, 16, 128>}]} {
    %c0 = arith.constant 0 : index
    %c0_0 = arith.constant 0 : index
    %0 = vector.load %arg3[%c0, %c0_0] : memref<18x18xf32, #tpu.memory_space<vmem>>, vector<18x16xf32>
    %c0_1 = arith.constant 0 : index
    %c16 = arith.constant 16 : index
    %1 = vector.load %arg3[%c0_1, %c16] : memref<18x18xf32, #tpu.memory_space<vmem>>, vector<18x1xf32>
    %c0_2 = arith.constant 0 : index
    %c17 = arith.constant 17 : index
    %2 = vector.load %arg3[%c0_2, %c17] : memref<18x18xf32, #tpu.memory_space<vmem>>, vector<16x1xf32>
    %3 = tpu.iota {dimensions = array<i32: 0>} : vector<128x128xi32>
    %4 = tpu.iota {dimensions = array<i32: 1>} : vector<128x128xi32>
    %c0_i32 = arith.constant 0 : i32
    %5 = vector.broadcast %c0_i32 : i32 to vector<128x128xi32>
    %c0_i32_3 = arith.constant 0 : i32
    %6 = vector.broadcast %c0_i32_3 : i32 to vector<128x128xi32>
    %c16_i32 = arith.constant 16 : i32
    %7 = vector.broadcast %c16_i32 : i32 to vector<128x128xi32>
    %8 = arith.cmpi sge, %3, %7 : vector<128x128xi32>
    %9 = arith.extui %8 : vector<128x128xi1> to vector<128x128xi32>
    %10 = arith.addi %5, %9 : vector<128x128xi32>
    %c16_i32_4 = arith.constant 16 : i32
    %11 = vector.broadcast %c16_i32_4 : i32 to vector<128x128xi32>
    %12 = arith.cmpi sge, %4, %11 : vector<128x128xi32>
    %13 = arith.extui %12 : vector<128x128xi1> to vector<128x128xi32>
    %14 = arith.addi %6, %13 : vector<128x128xi32>
    %c32_i32 = arith.constant 32 : i32
    %15 = vector.broadcast %c32_i32 : i32 to vector<128x128xi32>
    %16 = arith.cmpi sge, %3, %15 : vector<128x128xi32>
    %17 = arith.extui %16 : vector<128x128xi1> to vector<128x128xi32>
    %18 = arith.addi %10, %17 : vector<128x128xi32>
    %c32_i32_5 = arith.constant 32 : i32
    %19 = vector.broadcast %c32_i32_5 : i32 to vector<128x128xi32>
    %20 = arith.cmpi sge, %4, %19 : vector<128x128xi32>
    %21 = arith.extui %20 : vector<128x128xi1> to vector<128x128xi32>
    %22 = arith.addi %14, %21 : vector<128x128xi32>
    %c48_i32 = arith.constant 48 : i32
    %23 = vector.broadcast %c48_i32 : i32 to vector<128x128xi32>
    %24 = arith.cmpi sge, %3, %23 : vector<128x128xi32>
    %25 = arith.extui %24 : vector<128x128xi1> to vector<128x128xi32>
    %26 = arith.addi %18, %25 : vector<128x128xi32>
    %c48_i32_6 = arith.constant 48 : i32
    %27 = vector.broadcast %c48_i32_6 : i32 to vector<128x128xi32>
    %28 = arith.cmpi sge, %4, %27 : vector<128x128xi32>
    %29 = arith.extui %28 : vector<128x128xi1> to vector<128x128xi32>
    %30 = arith.addi %22, %29 : vector<128x128xi32>
    %c64_i32 = arith.constant 64 : i32
    %31 = vector.broadcast %c64_i32 : i32 to vector<128x128xi32>
    %32 = arith.cmpi sge, %3, %31 : vector<128x128xi32>
    %33 = arith.extui %32 : vector<128x128xi1> to vector<128x128xi32>
    %34 = arith.addi %26, %33 : vector<128x128xi32>
    %c64_i32_7 = arith.constant 64 : i32
    %35 = vector.broadcast %c64_i32_7 : i32 to vector<128x128xi32>
    %36 = arith.cmpi sge, %4, %35 : vector<128x128xi32>
    %37 = arith.extui %36 : vector<128x128xi1> to vector<128x128xi32>
    %38 = arith.addi %30, %37 : vector<128x128xi32>
    %c80_i32 = arith.constant 80 : i32
    %39 = vector.broadcast %c80_i32 : i32 to vector<128x128xi32>
    %40 = arith.cmpi sge, %3, %39 : vector<128x128xi32>
    %41 = arith.extui %40 : vector<128x128xi1> to vector<128x128xi32>
    %42 = arith.addi %34, %41 : vector<128x128xi32>
    %c80_i32_8 = arith.constant 80 : i32
    %43 = vector.broadcast %c80_i32_8 : i32 to vector<128x128xi32>
    %44 = arith.cmpi sge, %4, %43 : vector<128x128xi32>
    %45 = arith.extui %44 : vector<128x128xi1> to vector<128x128xi32>
    %46 = arith.addi %38, %45 : vector<128x128xi32>
    %c96_i32 = arith.constant 96 : i32
    %47 = vector.broadcast %c96_i32 : i32 to vector<128x128xi32>
    %48 = arith.cmpi sge, %3, %47 : vector<128x128xi32>
    %49 = arith.extui %48 : vector<128x128xi1> to vector<128x128xi32>
    %50 = arith.addi %42, %49 : vector<128x128xi32>
    %c96_i32_9 = arith.constant 96 : i32
    %51 = vector.broadcast %c96_i32_9 : i32 to vector<128x128xi32>
    %52 = arith.cmpi sge, %4, %51 : vector<128x128xi32>
    %53 = arith.extui %52 : vector<128x128xi1> to vector<128x128xi32>
    %54 = arith.addi %46, %53 : vector<128x128xi32>
    %c112_i32 = arith.constant 112 : i32
    %55 = vector.broadcast %c112_i32 : i32 to vector<128x128xi32>
    %56 = arith.cmpi sge, %3, %55 : vector<128x128xi32>
    %57 = arith.extui %56 : vector<128x128xi1> to vector<128x128xi32>
    %58 = arith.addi %50, %57 : vector<128x128xi32>
    %c112_i32_10 = arith.constant 112 : i32
    %59 = vector.broadcast %c112_i32_10 : i32 to vector<128x128xi32>
    %60 = arith.cmpi sge, %4, %59 : vector<128x128xi32>
    %61 = arith.extui %60 : vector<128x128xi1> to vector<128x128xi32>
    %62 = arith.addi %54, %61 : vector<128x128xi32>
    %63 = arith.cmpi eq, %58, %62 : vector<128x128xi32>
    %c0_11 = arith.constant 0 : index
    %c0_12 = arith.constant 0 : index
    %c0_13 = arith.constant 0 : index
    %64 = vector.load %arg2[%c0_11, %c0_12, %c0_13] : memref<2x16x128xf32, #tpu.memory_space<vmem>>, vector<1x16x128xf32>
    %65 = vector.shape_cast %64 : vector<1x16x128xf32> to vector<16x128xf32>
    %cst = arith.constant dense<0.000000e+00> : vector<18x128xf32>
    %66 = tpu.matmul %0, %65, %cst {dimension_numbers = #tpu.dot_dimension_numbers<[1], [0], [0], [1], [0, 0, 1, 1], [], []>} : vector<18x16xf32>, vector<16x128xf32>, vector<18x128xf32> -> vector<18x128xf32>
    %67 = vector.broadcast %1 : vector<18x1xf32> to vector<18x128xf32>
    %68 = arith.addf %66, %67 : vector<18x128xf32>
    %69 = vector.extract_strided_slice %68 {offsets = [0, 0], sizes = [16, 128], strides = [1, 1]} : vector<18x128xf32> to vector<16x128xf32>
    %70 = vector.extract_strided_slice %68 {offsets = [16, 0], sizes = [1, 128], strides = [1, 1]} : vector<18x128xf32> to vector<1x128xf32>
    %71 = vector.extract_strided_slice %68 {offsets = [17, 0], sizes = [1, 128], strides = [1, 1]} : vector<18x128xf32> to vector<1x128xf32>
    %72 = tpu.transpose %71, [1, 0] : vector<1x128xf32> -> vector<128x1xf32>
    %73 = vector.broadcast %72 : vector<128x1xf32> to vector<128x128xf32>
    %74 = vector.broadcast %70 : vector<1x128xf32> to vector<128x128xf32>
    %75 = arith.addf %73, %74 : vector<128x128xf32>
    %cst_14 = arith.constant 0.000000e+00 : f32
    %76 = vector.broadcast %cst_14 : f32 to vector<128x128xf32>
    %77 = arith.maximumf %75, %76 : vector<128x128xf32>
    %cst_15 = arith.constant 0.000000e+00 : f32
    %78 = vector.broadcast %cst_15 : f32 to vector<128x128xf32>
    %79 = arith.select %63, %77, %78 : vector<128x128xi1>, vector<128x128xf32>
    %cst_16 = arith.constant dense<0.000000e+00> : vector<16x128xf32>
    %80 = tpu.matmul %69, %79, %cst_16 {dimension_numbers = #tpu.dot_dimension_numbers<[1], [0], [0], [1], [0, 0, 1, 1], [], []>} : vector<16x128xf32>, vector<128x128xf32>, vector<16x128xf32> -> vector<16x128xf32>
    %81 = vector.broadcast %2 : vector<16x1xf32> to vector<16x128xf32>
    %82 = arith.addf %80, %81 : vector<16x128xf32>
    %83 = arith.addf %82, %65 : vector<16x128xf32>
    %c0_17 = arith.constant 0 : index
    %c0_18 = arith.constant 0 : index
    %c0_19 = arith.constant 0 : index
    %84 = vector.load %arg4[%c0_17, %c0_18, %c0_19] : memref<2x16x128xf32, #tpu.memory_space<vmem>>, vector<1x16x128xf32>
    %85 = vector.shape_cast %84 : vector<1x16x128xf32> to vector<16x128xf32>
    %86 = vector.shape_cast %83 : vector<16x128xf32> to vector<1x16x128xf32>
    tpu.vector_store %arg4[%c0_17, %c0_18, %c0_19], %86 {strides = array<i32>} : memref<2x16x128xf32, #tpu.memory_space<vmem>>, vector<1x16x128xf32>,
    %c1 = arith.constant 1 : index
    %c0_20 = arith.constant 0 : index
    %c0_21 = arith.constant 0 : index
    %87 = vector.load %arg2[%c1, %c0_20, %c0_21] : memref<2x16x128xf32, #tpu.memory_space<vmem>>, vector<1x16x128xf32>
    %88 = vector.shape_cast %87 : vector<1x16x128xf32> to vector<16x128xf32>
    %cst_22 = arith.constant dense<0.000000e+00> : vector<18x128xf32>
    %89 = tpu.matmul %0, %88, %cst_22 {dimension_numbers = #tpu.dot_dimension_numbers<[1], [0], [0], [1], [0, 0, 1, 1], [], []>} : vector<18x16xf32>, vector<16x128xf32>, vector<18x128xf32> -> vector<18x128xf32>
    %90 = vector.broadcast %1 : vector<18x1xf32> to vector<18x128xf32>
    %91 = arith.addf %89, %90 : vector<18x128xf32>
    %92 = vector.extract_strided_slice %91 {offsets = [0, 0], sizes = [16, 128], strides = [1, 1]} : vector<18x128xf32> to vector<16x128xf32>
    %93 = vector.extract_strided_slice %91 {offsets = [16, 0], sizes = [1, 128], strides = [1, 1]} : vector<18x128xf32> to vector<1x128xf32>
    %94 = vector.extract_strided_slice %91 {offsets = [17, 0], sizes = [1, 128], strides = [1, 1]} : vector<18x128xf32> to vector<1x128xf32>
    %95 = tpu.transpose %94, [1, 0] : vector<1x128xf32> -> vector<128x1xf32>
    %96 = vector.broadcast %95 : vector<128x1xf32> to vector<128x128xf32>
    %97 = vector.broadcast %93 : vector<1x128xf32> to vector<128x128xf32>
    %98 = arith.addf %96, %97 : vector<128x128xf32>
    %cst_23 = arith.constant 0.000000e+00 : f32
    %99 = vector.broadcast %cst_23 : f32 to vector<128x128xf32>
    %100 = arith.maximumf %98, %99 : vector<128x128xf32>
    %cst_24 = arith.constant 0.000000e+00 : f32
    %101 = vector.broadcast %cst_24 : f32 to vector<128x128xf32>
    %102 = arith.select %63, %100, %101 : vector<128x128xi1>, vector<128x128xf32>
    %cst_25 = arith.constant dense<0.000000e+00> : vector<16x128xf32>
    %103 = tpu.matmul %92, %102, %cst_25 {dimension_numbers = #tpu.dot_dimension_numbers<[1], [0], [0], [1], [0, 0, 1, 1], [], []>} : vector<16x128xf32>, vector<128x128xf32>, vector<16x128xf32> -> vector<16x128xf32>
    %104 = vector.broadcast %2 : vector<16x1xf32> to vector<16x128xf32>
    %105 = arith.addf %103, %104 : vector<16x128xf32>
    %106 = arith.addf %105, %88 : vector<16x128xf32>
    %c1_26 = arith.constant 1 : index
    %c0_27 = arith.constant 0 : index
    %c0_28 = arith.constant 0 : index
    %107 = vector.load %arg4[%c1_26, %c0_27, %c0_28] : memref<2x16x128xf32, #tpu.memory_space<vmem>>, vector<1x16x128xf32>
    %108 = vector.shape_cast %107 : vector<1x16x128xf32> to vector<16x128xf32>
    %109 = vector.shape_cast %106 : vector<16x128xf32> to vector<1x16x128xf32>
    tpu.vector_store %arg4[%c1_26, %c0_27, %c0_28], %109 {strides = array<i32>} : memref<2x16x128xf32, #tpu.memory_space<vmem>>, vector<1x16x128xf32>,
    return
  }
  func.func @transform_0(%arg0: i32, %arg1: i32) -> (i32, i32, i32) {
    %c0_i32 = arith.constant 0 : i32
    %c0_i32_0 = arith.constant 0 : i32
    return %arg0, %c0_i32, %arg1 : i32, i32, i32
  }
  func.func @transform_1(%arg0: i32, %arg1: i32) -> (i32, i32) {
    %c0_i32 = arith.constant 0 : i32
    %c0_i32_0 = arith.constant 0 : i32
    %c0_i32_1 = arith.constant 0 : i32
    return %c0_i32, %c0_i32_0 : i32, i32
  }
  func.func @transform_2(%arg0: i32, %arg1: i32) -> (i32, i32, i32) {
    %c0_i32 = arith.constant 0 : i32
    %c0_i32_0 = arith.constant 0 : i32
    return %arg0, %c0_i32, %arg1 : i32, i32, i32
  }
}

</mosaic_0001>

<bundles_post_ra>
// kernel: tpu_custom_call.1
= control target key start
LH: loop header
LB: loop body
LE: loop exit
PB: predicated region body
PF: predicated region fallthrough
CT: control target
= control target key end

     0   :  { %7 = vsyncpa [#allocation3], 0  ;;  %s1709_s0 = inlined_call_operand.hbm [shape: f32[2,16,128], index: 0, kind: input, shape index: {}, may-alias: {0,2}]   ;;  %s1710_s1 = inlined_call_operand.vmem [shape: f32[18,18], index: 1, kind: input, shape index: {}]   ;;  %s1711_s2 = inlined_call_operand.hbm [shape: f32[2,16,128], index: 2, kind: output, shape index: {}, may-alias: {0,2}]  }
   0x1   :  { %8 = vsyncpa [#allocation4], 0  ;;  %s1472_s9 = smov [#allocation2]   ;;  %s1424_s13 = scalar_lea.hbm %s1709_s0, 512 }
   0x2   :  { %s14_s10 = sshll.u32 %s1472_s9, 4  ;;  %p1425_p0 = scmp.ne.s32.totalorder %s1709_s0, %s1424_s13  ;;  %s15_s10 = int_to_ptr.vmem [resolvable:$true] %s14_s10 }
   0x3   :  { %p1428_p1 = scmp.lt.u32.totalorder %s1424_s13, %s1709_s0 }
   0x5   :  { %p1430_p2 = pnand %p1428_p1, %p1425_p0 }
   0x7   :  { %1433 = shalt.err (!%p1430_p2)
}
   0x8   :  { %s1434_s18 = scalar_lea.vmem %s15_s10, 512  ;;  %p1439_p4 = scmp.lt.s32.totalorder %s15_s10, %s15_s10 }
   0x9   :  { %p1435_p3 = scmp.ne.s32.totalorder %s15_s10, %s1434_s18  ;;  %p1440_p5 = scmp.lt.s32.totalorder %s1434_s18, %s1434_s18 }
   0xb   :  { %p1441_p6 = por %p1440_p5, %p1439_p4 }
   0xd   :  { %p1442_p7 = pnand %p1441_p6, %p1435_p3 }
   0xf   :  { %1445 = shalt.err (!%p1442_p7)
}
  0x10   :  { %s1473_s19 = smov 128   ;;  %s1474_s20 = smov 8  }
  0x11   :  { %20 = dma.hbm_to_vmem [thread:$0]  %s1709_s0, 512, %s15_s10, [#allocation3], %s1473_s19, %s1473_s19, %s1474_s20  }
  0x12   :  { %1468 = dma.done.wait [#allocation3], 512  }
  0x13   :  { %1469 = vsyncadd [#allocation3], 4294966784  ;;  %v1475_v0 = vmov 0.0|0.0   ;;  %vm1476_vm0 = vmmov 0   ;;  %v1477_v1 = vmov 0.0   ;;  %v1478_v2 = vmov 16  }
  0x14   :  { %1305 = vmatprep.subr.bf16.mxu1 %v1475_v0  ;;  %1356 = vmatprep.subr.bf16.mxu0 %v1475_v0  ;;  %v1515_v3 = vld [vmem:[#allocation2] sm:$0xff]  ;;  %v1517_v4 = vld [vmem:[#allocation2 + $0x8] sm:$0xff]  ;;  %v1519_v5 = vld [vmem:[#allocation2 + $0x10] sm:$0xff]  ;;  %vm421_vm1 = vcmask 130048   ;;  %v1479_v29 = vmov 0   ;;  %v1480_v62 = vmov 17   ;;  %v46_v63 = vlaneseq }
  0x15   :  { %1213 = vmatprep.mubr.msk.f32.mxu1 %vm1476_vm0, %v1477_v1  ;;  %1261 = vmatprep.mubr.msk.f32.mxu0 %vm1476_vm0, %v1477_v1  ;;  %v1306_v6 = vpack.c.bf16 %v1517_v4, %v1515_v3  ;;  %v1523_v7 = vld [vmem:[#allocation2 + $0x18] sm:$0xff]  ;;  %v28_v9 = vld [vmem:[%s1710_s1 + $0x10] sm:$0x3]  ;;  %v1533_v10 = vld [vmem:[%s1710_s1] sm:$0xff] }
  0x16   :  { %1417 = vset.pattern.permute.xlu0 %v1478_v2  ;;  %v1357_v8 = vpack.c.bf16 %v1523_v7, %v1519_v5  ;;  %v1541_v11 = vld [vmem:[%s1710_s1 + $0x8] sm:$0xff]  ;;  %v47_v0 = vand.u32 127, %v46_v63  ;;  %s1481_s1 = smov [#allocation5]  }
  0x17   :  { %1307 = vmatpush3.bf16.msra.mxu1 %v1306_v6  ;;  %418 = vperm.xlu0 %1417, %v28_v9   ;;  %s1097_s28 = sshll.u32 %s1481_s1, 4  ;;  %s1098_s28 = int_to_ptr.vmem [resolvable:$true] %s1097_s28 }
  0x18   :  { %1358 = vmatpush3.bf16.msra.mxu0 %v1357_v8  ;;  %vm80_vm2 = vcmp.ge.s32.totalorder %v47_v0, 16  ;;  %vm130_vm3 = vcmp.ge.s32.totalorder %v47_v0, 32  ;;  %vm181_vm4 = vcmp.ge.s32.totalorder %v47_v0, 48  ;;  %vm232_vm5 = vcmp.ge.s32.totalorder %v47_v0, 64  ;;  %s1446_s29 = scalar_lea.vmem %s1098_s28, 512  ;;  %p1451_p9 = scmp.lt.s32.totalorder %s1098_s28, %s1098_s28 }
  0x19   :  { %v131_v6 = vsel %vm130_vm3, 1, %v1479_v29  ;;  %vm283_vm6 = vcmp.ge.s32.totalorder %v47_v0, 80  ;;  %vm334_vm7 = vcmp.ge.s32.totalorder %v47_v0, 96  ;;  %vm385_vm8 = vcmp.ge.s32.totalorder %v47_v0, 112  ;;  %p1447_p8 = scmp.ne.s32.totalorder %s1098_s28, %s1446_s29  ;;  %p1452_p10 = scmp.lt.s32.totalorder %s1446_s29, %s1446_s29 }
  0x1a   :  { %1214 = vmatmul.mubr.msk.f32.vlgmr.msra.gmra.mrb[0].mxu1 %vm421_vm1, %v1533_v10 }
  0x1b   :  { %1262 = vmatmul.mubr.msk.f32.vlgmr.msra.gmra.mrb[0].mxu0 %vm421_vm1, %v1533_v10  ;;  %1216 = vmatprep.mubr.msk.f32.mxu1 %vm1476_vm0, %v1477_v1  ;;  %p1453_p11 = por %p1452_p10, %p1451_p9 }
  0x1c   :  { %1264 = vmatprep.mubr.msk.f32.mxu0 %vm1476_vm0, %v1477_v1 }
  0x1d   :  { %p1454_p12 = pnand %p1453_p11, %p1447_p8 }
  0x1e   :  { %1217 = vmatmul.mubr.msk.f32.gmra.mrb[2].mxu1 %vm421_vm1, %v1541_v11 }
  0x1f   :  { %1265 = vmatmul.mubr.msk.f32.gmra.mrb[2].mxu0 %vm421_vm1, %v1541_v11  ;;  %1219 = vmatprep.mubr.msk.f32.mxu1 %vm1476_vm0, %v1477_v1 }
  0x20   :  { %1267 = vmatprep.mubr.msk.f32.mxu0 %vm1476_vm0, %v1477_v1  ;;  %v81_v1 = vsel %vm80_vm2, 1, %v1479_v29 }
  0x21   :  { %v132_v8 = vadd.s32 %v131_v6, %v81_v1 }
  0x22   :  { %1220 = vmatmul.mubr.msk.f32.gmra.mrb[4].mxu1 %vm421_vm1, %v28_v9 }
  0x23   :  { %1268 = vmatmul.mubr.msk.f32.gmra.mrb[4].mxu0 %vm421_vm1, %v28_v9 }
  0x96   :  { %v419_v20 = vpop.permute.xlu0 %418 }
  0xed   :  { %v1548_v12 = vpop.f32.mrb[0].mxu1 }
  0xee   :  { %v1215_v13 = vpop.f32.mrb[1].mxu1  ;;  %v1550_v14 = vpop.f32.mrb[0].mxu0 }
  0xef   :  { %v1263_v15 = vpop.f32.mrb[1].mxu0  ;;  %v233_v13 = vsel %vm232_vm5, 1, %v1479_v29 }
  0xf0   :  { %v284_v15 = vsel %vm283_vm6, 1, %v1479_v29 }
  0xf1   :  { %v1552_v16 = vpop.f32.mrb[2].mxu1 }
  0xf2   :  { %v1218_v17 = vpop.f32.mrb[3].mxu1  ;;  %v1554_v18 = vpop.f32.mrb[2].mxu0 }
  0xf3   :  { %v1266_v19 = vpop.f32.mrb[3].mxu0 }
  0xf4   :  { %v335_v19 = vsel %vm334_vm7, 1, %v1479_v29 }
  0xf5   :  { %v504_v21 = vpop.f32.mrb[4].mxu1 }
  0xf6   :  { %v1556_v22 = vadd.f32 %v504_v21, %v419_v20  ;;  %v841_v23 = vpop.f32.mrb[4].mxu0  ;;  %v1221_v24 = vpop.f32.mrb[5].mxu1 }
  0xf7   :  { %v1558_v25 = vadd.f32 %v841_v23, %v419_v20  ;;  %v1269_v26 = vpop.f32.mrb[5].mxu0  ;;  %v386_v23 = vsel %vm385_vm8, 1, %v1479_v29 }
  0xf8   :  { %v509_v27 = vrot.slane %v1556_v22, 1 }
  0xf9   :  { %v846_v28 = vrot.slane %v1558_v25, 1 }
  0xfa   :  { %511 = vxpose.xlu0.b32.start.end [1/1] (short) %v509_v27, 128 }
  0xfb   :  { %848 = vxpose.xlu1.b32.start.end [1/1] (short) %v846_v28, 128 }
 0x119   :  { %1418 = vset.pattern.permute.xlu1 %v1479_v29 }
 0x123   :  { %1419 = vset.pattern.permute.xlu0 %v1479_v29 }
 0x17a   :  { %v527_v30 = vpop.trf.xlu0 }
 0x17b   :  { %545 = vperm.xlu1 %1418, %v527_v30   ;;  %v864_v31 = vpop.trf.xlu1 }
 0x17e   :  { %v528_v32 = vpop.trf.xlu0 }
 0x17f   :  { %882 = vperm.xlu1 %1418, %v864_v31   ;;  %550 = vperm.xlu0 %1419, %v528_v32   ;;  %v865_v33 = vpop.trf.xlu1 }
 0x182   :  { %v529_v34 = vpop.trf.xlu0 }
 0x183   :  { %887 = vperm.xlu1 %1418, %v865_v33   ;;  %v866_v35 = vpop.trf.xlu1 }
 0x186   :  { %v530_v36 = vpop.trf.xlu0 }
 0x187   :  { %555 = vperm.xlu1 %1418, %v529_v34   ;;  %v867_v37 = vpop.trf.xlu1 }
 0x18a   :  { %v531_v38 = vpop.trf.xlu0 }
 0x18b   :  { %892 = vperm.xlu1 %1418, %v866_v35   ;;  %v868_v39 = vpop.trf.xlu1 }
 0x18e   :  { %v532_v40 = vpop.trf.xlu0 }
 0x18f   :  { %560 = vperm.xlu1 %1418, %v530_v36   ;;  %v869_v41 = vpop.trf.xlu1 }
 0x192   :  { %v533_v42 = vpop.trf.xlu0 }
 0x193   :  { %897 = vperm.xlu1 %1418, %v867_v37   ;;  %v870_v43 = vpop.trf.xlu1 }
 0x196   :  { %v534_v44 = vpop.trf.xlu0 }
 0x197   :  { %565 = vperm.xlu1 %1418, %v531_v38   ;;  %580 = vperm.xlu0 %1419, %v534_v44   ;;  %v871_v45 = vpop.trf.xlu1 }
 0x19a   :  { %v535_v46 = vpop.trf.xlu0 }
 0x19b   :  { %902 = vperm.xlu1 %1418, %v868_v39   ;;  %917 = vperm.xlu0 %1419, %v871_v45   ;;  %v872_v47 = vpop.trf.xlu1 }
 0x19e   :  { %v536_v48 = vpop.trf.xlu0 }
 0x19f   :  { %570 = vperm.xlu1 %1418, %v532_v40   ;;  %590 = vperm.xlu0 %1419, %v536_v48   ;;  %v873_v49 = vpop.trf.xlu1 }
 0x1a2   :  { %v537_v50 = vpop.trf.xlu0 }
 0x1a3   :  { %907 = vperm.xlu1 %1418, %v869_v41   ;;  %927 = vperm.xlu0 %1419, %v873_v49   ;;  %v874_v51 = vpop.trf.xlu1 }
 0x1a6   :  { %v538_v52 = vpop.trf.xlu0 }
 0x1a7   :  { %575 = vperm.xlu1 %1418, %v533_v42   ;;  %600 = vperm.xlu0 %1419, %v538_v52   ;;  %v875_v53 = vpop.trf.xlu1 }
 0x1aa   :  { %v539_v54 = vpop.trf.xlu0 }
 0x1ab   :  { %912 = vperm.xlu1 %1418, %v870_v43   ;;  %937 = vperm.xlu0 %1419, %v875_v53   ;;  %v876_v55 = vpop.trf.xlu1 }
 0x1ae   :  { %v540_v56 = vpop.trf.xlu0 }
 0x1af   :  { %585 = vperm.xlu1 %1418, %v535_v46   ;;  %610 = vperm.xlu0 %1419, %v540_v56   ;;  %v877_v57 = vpop.trf.xlu1 }
 0x1b2   :  { %v541_v58 = vpop.trf.xlu0 }
 0x1b3   :  { %922 = vperm.xlu1 %1418, %v872_v47   ;;  %947 = vperm.xlu0 %1419, %v877_v57   ;;  %v878_v59 = vpop.trf.xlu1 }
 0x1b6   :  { %v542_v60 = vpop.trf.xlu0 }
 0x1b7   :  { %595 = vperm.xlu1 %1418, %v537_v50   ;;  %620 = vperm.xlu0 %1419, %v542_v60   ;;  %v879_v61 = vpop.trf.xlu1 }
 0x1bb   :  { %932 = vperm.xlu1 %1418, %v874_v51   ;;  %957 = vperm.xlu0 %1419, %v879_v61  }
 0x1bf   :  { %605 = vperm.xlu1 %1418, %v539_v54   ;;  %1421 = vset.pattern.permute.xlu0 %v1478_v2 }
 0x1c0   :  { %413 = vperm.xlu0 %1421, %v1541_v11  }
 0x1c3   :  { %942 = vperm.xlu1 %1418, %v876_v55  }
 0x1c4   :  { %1423 = vset.pattern.permute.xlu0 %v1479_v29 }
 0x1c7   :  { %615 = vperm.xlu1 %1418, %v541_v58  }
 0x1cb   :  { %952 = vperm.xlu1 %1418, %v878_v59  }
 0x1cf   :  { %1420 = vset.pattern.permute.xlu1 %v1478_v2  ;;  %v182_v2 = vsel %vm181_vm4, 1, %v1479_v29 }
 0x1d0   :  { %408 = vperm.xlu1 %1420, %v1533_v10   ;;  %v183_v9 = vadd.s32 %v182_v2, %v132_v8 }
 0x1d4   :  { %1422 = vset.pattern.permute.xlu1 %v1480_v62 }
 0x1d5   :  { %676 = vperm.xlu1 %1422, %v1533_v10   ;;  %v234_v10 = vadd.s32 %v233_v13, %v183_v9 }
 0x1d7   :  { %v285_v17 = vadd.s32 %v284_v15, %v234_v10 }
 0x1d9   :  { %680 = vperm.xlu1 %1422, %v1541_v11   ;;  %v624_v11 = vshrl.u32 %v46_v63, 7  ;;  %v336_v21 = vadd.s32 %v335_v19, %v285_v17 }
 0x1db   :  { %v625_v20 = vsub.s32 0, %v624_v11  ;;  %v1581_v27 = vadd.s32 %v386_v23, %v336_v21 }
 0x1dd   :  { %v1579_v26 = vrot.slane %v1556_v22, %v625_v20  ;;  %v1585_v32 = vrot.slane %v1558_v25, %v625_v20  ;;  %vm1109_vm9 = vcmp.eq.s32.totalorder %v1581_v27, 0  ;;  %vm1111_vm11 = vcmp.eq.s32.totalorder %v1581_v27, 1 }
 0x1de   :  { %vm1309_vm10 = vmpackc.low %vm1109_vm9, %vm1109_vm9  ;;  %vm1113_vm13 = vcmp.eq.s32.totalorder %v1581_v27, 2  ;;  %vm1115_vm15 = vcmp.eq.s32.totalorder %v1581_v27, 3  ;;  %vm1117_vm1 = vcmp.eq.s32.totalorder %v1581_v27, 4  ;;  %vm1119_vm3 = vcmp.eq.s32.totalorder %v1581_v27, 5 }
 0x1df   :  { %vm1315_vm12 = vmpackc.low %vm1111_vm11, %vm1111_vm11  ;;  %vm1121_vm5 = vcmp.eq.s32.totalorder %v1581_v27, 6  ;;  %vm1123_vm7 = vcmp.eq.s32.totalorder %v1581_v27, 7 }
 0x1e0   :  { %vm1600_vm14 = vmpackc.low %vm1113_vm13, %vm1113_vm13 }
 0x1e1   :  { %vm1617_vm0 = vmpackc.low %vm1115_vm15, %vm1115_vm15 }
 0x1e2   :  { %vm1634_vm2 = vmpackc.low %vm1117_vm1, %vm1117_vm1 }
 0x1e3   :  { %vm1651_vm4 = vmpackc.low %vm1119_vm3, %vm1119_vm3 }
 0x1e4   :  { %vm1668_vm6 = vmpackc.low %vm1121_vm5, %vm1121_vm5 }
 0x1e5   :  { %vm1351_vm8 = vmpackc.low %vm1123_vm7, %vm1123_vm7 }
 0x1fa   :  { %v546_v24 = vpop.permute.xlu1 %545 }
 0x1fb   :  { %v627_v28 = vadd.f32 %v1579_v26, %v546_v24 }
 0x1fd   :  { %v643_v34 = vmax.f32 %v627_v28, 0.0 }
 0x1fe   :  { %v883_v30 = vpop.permute.xlu1 %882  ;;  %v551_v31 = vpop.permute.xlu0 %550 }
 0x1ff   :  { %v628_v33 = vadd.f32 %v1579_v26, %v551_v31  ;;  %v964_v29 = vadd.f32 %v1585_v32, %v883_v30 }
 0x201   :  { %v644_v35 = vmax.f32 %v628_v33, 0.0  ;;  %v980_v38 = vmax.f32 %v964_v29, 0.0 }
 0x202   :  { %v888_v36 = vpop.permute.xlu1 %887 }
 0x203   :  { %v1308_v22 = vpack.c.bf16 %v644_v35, %v643_v34  ;;  %v965_v37 = vadd.f32 %v1585_v32, %v888_v36 }
 0x205   :  { %v981_v39 = vmax.f32 %v965_v37, 0.0  ;;  %1310 = vmatprep.subr.msk.bf16.mxu1 %vm1309_vm10, %v1308_v22 }
 0x206   :  { %v556_v40 = vpop.permute.xlu1 %555  ;;  %1313 = vmatpush3.bf16.msk.msra.mxu1 %vm1309_vm10, %v1308_v22 }
 0x207   :  { %v1359_v25 = vpack.c.bf16 %v981_v39, %v980_v38  ;;  %v629_v42 = vadd.f32 %v1579_v26, %v556_v40 }
 0x209   :  { %1361 = vmatprep.subr.msk.bf16.mxu0 %vm1309_vm10, %v1359_v25  ;;  %v645_v45 = vmax.f32 %v629_v42, 0.0 }
 0x20a   :  { %1364 = vmatpush3.bf16.msk.msra.mxu0 %vm1309_vm10, %v1359_v25  ;;  %v893_v41 = vpop.permute.xlu1 %892 }
 0x20b   :  { %v966_v46 = vadd.f32 %v1585_v32, %v893_v41 }
 0x20d   :  { %v982_v51 = vmax.f32 %v966_v46, 0.0 }
 0x20e   :  { %v561_v43 = vpop.permute.xlu1 %560 }
 0x20f   :  { %v630_v44 = vadd.f32 %v1579_v26, %v561_v43 }
 0x211   :  { %v646_v47 = vmax.f32 %v630_v44, 0.0 }
 0x212   :  { %v898_v48 = vpop.permute.xlu1 %897 }
 0x213   :  { %v1314_v49 = vpack.c.bf16 %v646_v47, %v645_v45  ;;  %v967_v50 = vadd.f32 %v1585_v32, %v898_v48 }
 0x215   :  { %v983_v52 = vmax.f32 %v967_v50, 0.0  ;;  %1316 = vmatprep.subr.msk.bf16.mxu1 %vm1315_vm12, %v1314_v49 }
 0x216   :  { %v566_v53 = vpop.permute.xlu1 %565  ;;  %1319 = vmatpush3.bf16.msk.msra.mxu1 %vm1315_vm12, %v1314_v49  ;;  %v581_v54 = vpop.permute.xlu0 %580 }
 0x217   :  { %v1365_v55 = vpack.c.bf16 %v983_v52, %v982_v51  ;;  %v631_v58 = vadd.f32 %v1579_v26, %v566_v53  ;;  %v634_v13 = vadd.f32 %v1579_v26, %v581_v54 }
 0x219   :  { %1367 = vmatprep.subr.msk.bf16.mxu0 %vm1315_vm12, %v1365_v55  ;;  %v647_v62 = vmax.f32 %v631_v58, 0.0  ;;  %v650_v21 = vmax.f32 %v634_v13, 0.0 }
 0x21a   :  { %1370 = vmatpush3.bf16.msk.msra.mxu0 %vm1315_vm12, %v1365_v55  ;;  %v903_v56 = vpop.permute.xlu1 %902  ;;  %v918_v57 = vpop.permute.xlu0 %917 }
 0x21b   :  { %v968_v63 = vadd.f32 %v1585_v32, %v903_v56  ;;  %v971_v23 = vadd.f32 %v1585_v32, %v918_v57 }
 0x21d   :  { %v984_v10 = vmax.f32 %v968_v63, 0.0  ;;  %v987_v34 = vmax.f32 %v971_v23, 0.0 }
 0x21e   :  { %v571_v59 = vpop.permute.xlu1 %570  ;;  %v591_v60 = vpop.permute.xlu0 %590 }
 0x21f   :  { %v632_v61 = vadd.f32 %v1579_v26, %v571_v59  ;;  %v636_v29 = vadd.f32 %v1579_v26, %v591_v60 }
 0x221   :  { %v648_v0 = vmax.f32 %v632_v61, 0.0  ;;  %v652_v39 = vmax.f32 %v636_v29, 0.0 }
 0x222   :  { %v908_v1 = vpop.permute.xlu1 %907  ;;  %v928_v6 = vpop.permute.xlu0 %927 }
 0x223   :  { %v1320_v2 = vpack.c.bf16 %v648_v0, %v647_v62  ;;  %v969_v9 = vadd.f32 %v1585_v32, %v908_v1  ;;  %v973_v40 = vadd.f32 %v1585_v32, %v928_v6 }
 0x225   :  { %v985_v15 = vmax.f32 %v969_v9, 0.0  ;;  %1322 = vmatprep.subr.msk.bf16.mxu1 %vm1600_vm14, %v1320_v2  ;;  %v989_v46 = vmax.f32 %v973_v40, 0.0 }
 0x226   :  { %v576_v11 = vpop.permute.xlu1 %575  ;;  %1325 = vmatpush3.bf16.msk.msra.mxu1 %vm1600_vm14, %v1320_v2  ;;  %v601_v20 = vpop.permute.xlu0 %600 }
 0x227   :  { %v1371_v17 = vpack.c.bf16 %v985_v15, %v984_v10  ;;  %v633_v19 = vadd.f32 %v1579_v26, %v576_v11  ;;  %v638_v47 = vadd.f32 %v1579_v26, %v601_v20 }
 0x229   :  { %v649_v24 = vmax.f32 %v633_v19, 0.0  ;;  %1373 = vmatprep.subr.msk.bf16.mxu0 %vm1600_vm14, %v1371_v17  ;;  %v654_v52 = vmax.f32 %v638_v47, 0.0 }
 0x22a   :  { %1376 = vmatpush3.bf16.msk.msra.mxu0 %vm1600_vm14, %v1371_v17  ;;  %v913_v28 = vpop.permute.xlu1 %912  ;;  %v938_v36 = vpop.permute.xlu0 %937 }
 0x22b   :  { %v1326_v31 = vpack.c.bf16 %v650_v21, %v649_v24  ;;  %v970_v33 = vadd.f32 %v1585_v32, %v913_v28  ;;  %v975_v53 = vadd.f32 %v1585_v32, %v938_v36 }
 0x22d   :  { %v986_v35 = vmax.f32 %v970_v33, 0.0  ;;  %1328 = vmatprep.subr.msk.bf16.mxu1 %vm1617_vm0, %v1326_v31  ;;  %v991_v60 = vmax.f32 %v975_v53, 0.0 }
 0x22e   :  { %v586_v22 = vpop.permute.xlu1 %585  ;;  %1331 = vmatpush3.bf16.msk.msra.mxu1 %vm1617_vm0, %v1326_v31  ;;  %v611_v45 = vpop.permute.xlu0 %610 }
 0x22f   :  { %v1377_v37 = vpack.c.bf16 %v987_v34, %v986_v35  ;;  %v635_v38 = vadd.f32 %v1579_v26, %v586_v22  ;;  %v640_v61 = vadd.f32 %v1579_v26, %v611_v45 }
 0x231   :  { %v651_v25 = vmax.f32 %v635_v38, 0.0  ;;  %1379 = vmatprep.subr.msk.bf16.mxu0 %vm1617_vm0, %v1377_v37  ;;  %v656_v8 = vmax.f32 %v640_v61, 0.0 }
 0x232   :  { %v923_v41 = vpop.permute.xlu1 %922  ;;  %1382 = vmatpush3.bf16.msk.msra.mxu0 %vm1617_vm0, %v1377_v37  ;;  %v948_v55 = vpop.permute.xlu0 %947 }
 0x233   :  { %v1332_v43 = vpack.c.bf16 %v652_v39, %v651_v25  ;;  %v972_v44 = vadd.f32 %v1585_v32, %v923_v41  ;;  %v977_v2 = vadd.f32 %v1585_v32, %v948_v55 }
 0x235   :  { %v988_v48 = vmax.f32 %v972_v44, 0.0  ;;  %1334 = vmatprep.subr.msk.bf16.mxu1 %vm1634_vm2, %v1332_v43  ;;  %v993_v17 = vmax.f32 %v977_v2, 0.0 }
 0x236   :  { %v596_v49 = vpop.permute.xlu1 %595  ;;  %1337 = vmatpush3.bf16.msk.msra.mxu1 %vm1634_vm2, %v1332_v43  ;;  %v621_v6 = vpop.permute.xlu0 %620 }
 0x237   :  { %v1383_v50 = vpack.c.bf16 %v989_v46, %v988_v48  ;;  %v637_v51 = vadd.f32 %v1579_v26, %v596_v49  ;;  %v642_v19 = vadd.f32 %v1579_v26, %v621_v6 }
 0x239   :  { %v653_v54 = vmax.f32 %v637_v51, 0.0  ;;  %1385 = vmatprep.subr.msk.bf16.mxu0 %vm1634_vm2, %v1383_v50  ;;  %v658_v30 = vmax.f32 %v642_v19, 0.0 }
 0x23a   :  { %v933_v56 = vpop.permute.xlu1 %932  ;;  %1388 = vmatpush3.bf16.msk.msra.mxu0 %vm1634_vm2, %v1383_v50  ;;  %v958_v21 = vpop.permute.xlu0 %957 }
 0x23b   :  { %v1338_v58 = vpack.c.bf16 %v654_v52, %v653_v54  ;;  %v974_v59 = vadd.f32 %v1585_v32, %v933_v56  ;;  %v979_v31 = vadd.f32 %v1585_v32, %v958_v21 }
 0x23d   :  { %v990_v62 = vmax.f32 %v974_v59, 0.0  ;;  %1340 = vmatprep.subr.msk.bf16.mxu1 %vm1651_vm4, %v1338_v58  ;;  %v995_v36 = vmax.f32 %v979_v31, 0.0 }
 0x23e   :  { %v606_v63 = vpop.permute.xlu1 %605  ;;  %1343 = vmatpush3.bf16.msk.msra.mxu1 %vm1651_vm4, %v1338_v58 }
 0x23f   :  { %v1389_v0 = vpack.c.bf16 %v991_v60, %v990_v62  ;;  %v639_v1 = vadd.f32 %v1579_v26, %v606_v63 }
 0x241   :  { %v655_v9 = vmax.f32 %v639_v1, 0.0  ;;  %1391 = vmatprep.subr.msk.bf16.mxu0 %vm1651_vm4, %v1389_v0 }
 0x242   :  { %v943_v13 = vpop.permute.xlu1 %942  ;;  %1394 = vmatpush3.bf16.msk.msra.mxu0 %vm1651_vm4, %v1389_v0 }
 0x243   :  { %v1344_v15 = vpack.c.bf16 %v656_v8, %v655_v9  ;;  %v976_v11 = vadd.f32 %v1585_v32, %v943_v13 }
 0x245   :  { %v992_v20 = vmax.f32 %v976_v11, 0.0  ;;  %1346 = vmatprep.subr.msk.bf16.mxu1 %vm1668_vm6, %v1344_v15 }
 0x246   :  { %v616_v23 = vpop.permute.xlu1 %615  ;;  %1349 = vmatpush3.bf16.msk.msra.mxu1 %vm1668_vm6, %v1344_v15 }
 0x247   :  { %v1395_v24 = vpack.c.bf16 %v993_v17, %v992_v20  ;;  %v641_v28 = vadd.f32 %v1579_v26, %v616_v23  ;;  %v414_v26 = vpop.permute.xlu0 %413 }
 0x248   :  { %v500_v40 = vadd.f32 %v1552_v16, %v414_v26  ;;  %v837_v25 = vadd.f32 %v1554_v18, %v414_v26 }
 0x249   :  { %v657_v33 = vmax.f32 %v641_v28, 0.0  ;;  %1397 = vmatprep.subr.msk.bf16.mxu0 %vm1668_vm6, %v1395_v24 }
 0x24a   :  { %v953_v34 = vpop.permute.xlu1 %952  ;;  %1400 = vmatpush3.bf16.msk.msra.mxu0 %vm1668_vm6, %v1395_v24 }
 0x24b   :  { %v1350_v29 = vpack.c.bf16 %v658_v30, %v657_v33  ;;  %v978_v35 = vadd.f32 %v1585_v32, %v953_v34 }
 0x24d   :  { %v994_v22 = vmax.f32 %v978_v35, 0.0  ;;  %1352 = vmatprep.subr.msk.bf16.mxu1 %vm1351_vm8, %v1350_v29 }
 0x24e   :  { %1355 = vmatpush3.bf16.msk.msra.mxu1 %vm1351_vm8, %v1350_v29 }
 0x24f   :  { %v1401_v27 = vpack.c.bf16 %v995_v36, %v994_v22  ;;  %v409_v37 = vpop.permute.xlu1 %408 }
 0x250   :  { %v495_v38 = vadd.f32 %v1548_v12, %v409_v37  ;;  %v832_v39 = vadd.f32 %v1550_v14, %v409_v37 }
 0x251   :  { %1403 = vmatprep.subr.msk.bf16.mxu0 %vm1351_vm8, %v1401_v27 }
 0x252   :  { %1254 = vmatprep.mubr.f32.mxu1 %v495_v38  ;;  %1406 = vmatpush3.bf16.msk.msra.mxu0 %vm1351_vm8, %v1401_v27 }
 0x253   :  { %1302 = vmatprep.mubr.f32.mxu0 %v832_v39  ;;  %1255 = vmatmul.mubr.f32.vlgmr.msra.gmra.mrb[6].mxu1 %v500_v40 }
 0x254   :  { %v677_v32 = vpop.permute.xlu1 %676 }
 0x255   :  { %1303 = vmatmul.mubr.f32.vlgmr.msra.gmra.mrb[6].mxu0 %v837_v25 }
 0x258   :  { %v681_v41 = vpop.permute.xlu1 %680 }
 0x326   :  { %v1256_v42 = vpop.f32.mrb[6].mxu1 }
 0x327   :  { %v755_v43 = vadd.f32 %v1256_v42, %v681_v41  ;;  %v749_v44 = vpop.f32.mrb[7].mxu1 }
 0x328   :  { %v750_v45 = vadd.f32 %v749_v44, %v677_v32  ;;  %v1304_v46 = vpop.f32.mrb[6].mxu0 }
 0x329   :  { %v759_v12 = vadd.f32 %v755_v43, %v1517_v4  ;;  %v1084_v14 = vadd.f32 %v1304_v46, %v681_v41  ;;  %v1078_v47 = vpop.f32.mrb[7].mxu0 }
 0x32a   :  { %v758_v16 = vadd.f32 %v750_v45, %v1515_v3  ;;  %v1079_v48 = vadd.f32 %v1078_v47, %v677_v32 }
 0x32b   :  { %761 = vst [vmem:[#allocation5 + $0x8] sm:$0xff] %v759_v12  ;;  %v1088_v18 = vadd.f32 %v1084_v14, %v1523_v7 }
 0x32c   :  { %760 = vst [vmem:[#allocation5] sm:$0xff] %v758_v16  ;;  %v1087_v49 = vadd.f32 %v1079_v48, %v1519_v5 }
 0x32d   :  { %1091 = vst [vmem:[#allocation5 + $0x18] sm:$0xff] %v1088_v18 }
 0x32e   :  { %1090 = vst [vmem:[#allocation5 + $0x10] sm:$0xff] %v1087_v49 }
 0x32f   :  { %1457 = shalt.err (!%p1454_p12)
}
 0x330   :  { %s1458_s4 = scalar_lea.hbm %s1711_s2, 512 }
 0x331   :  { %p1459_p13 = scmp.ne.s32.totalorder %s1711_s2, %s1458_s4  ;;  %p1462_p0 = scmp.lt.u32.totalorder %s1458_s4, %s1711_s2 }
 0x333   :  { %p1464_p1 = pnand %p1462_p0, %p1459_p13 }
 0x335   :  { %1467 = shalt.err (!%p1464_p1)
}
 0x336   :  { %1103 = dma.vmem_to_hbm [thread:$0]  %s1098_s28, 512, %s1711_s2, [#allocation4], %s1473_s19, %s1473_s19, %s1474_s20  }
 0x337   :  { %1470 = dma.done.wait [#allocation4], 512  }
 0x338   :  { %1471 = vsyncadd [#allocation4], 4294966784 }
 0x339   :  { %1107 = vsyncpa [#allocation3], 1 }
 0x33a   :  { %1108 = vsyncpa [#allocation4], 1 }

</bundles_post_ra>
